<compile_context>
chip_gen: v5e
topology: v5e:2x2
jax: 0.10.0
libtpu: 0.0.40
codegen_flags: <defaults>
</compile_context>

<pallas_src>
import jax
import jax.numpy as jnp
from jax.experimental import pallas as pl
from jax.experimental.pallas import tpu as pltpu

MID_DIM = 100        # fc2 output width hard-coded in the PyTorch module
_NEG_PAD = -1e30     # bias for padded logit columns: vanishes in log-sum-exp


def _round_up(n, m):
    return -(-n // m) * m


# ---------------------------------------------------------------------------
# Kernel
# ---------------------------------------------------------------------------
def _gen_lin_kernel(x_ref, w1_ref, b1_ref, w2_ref, b2_ref, w3_ref, b3_ref,
                    o_ref):
    x = x_ref[...]
    if x.dtype != w1_ref.dtype:          # bf16 path: feed the MXU bf16 inputs
        x = x.astype(w1_ref.dtype)

    # fc1 + ReLU (f32 accumulation on the MXU, bias/ReLU in f32)
    h = jnp.dot(x, w1_ref[...], preferred_element_type=jnp.float32)
    h = jnp.maximum(h + b1_ref[...], 0.0)                    # (TB, hidden_p)
    if h.dtype != w2_ref.dtype:
        h = h.astype(w2_ref.dtype)

    # fc2 + ReLU
    h = jnp.dot(h, w2_ref[...], preferred_element_type=jnp.float32)
    h = jnp.maximum(h + b2_ref[...], 0.0)                    # (TB, 128)
    if h.dtype != w3_ref.dtype:
        h = h.astype(w3_ref.dtype)

    # fc3 (padded logit columns carry a -1e30 bias -> drop out of the LSE)
    z = jnp.dot(h, w3_ref[...], preferred_element_type=jnp.float32) + b3_ref[...]

    # numerically stable log_softmax over dim=1 (lane dim)
    m = jnp.max(z, axis=-1, keepdims=True)
    s = z - m
    lse = jnp.log(jnp.sum(jnp.exp(s), axis=-1, keepdims=True))
    o_ref[...] = (s - lse).astype(o_ref.dtype)               # lane-dense store


# ---------------------------------------------------------------------------
# Wrapper
# ---------------------------------------------------------------------------
def _choose_batch_tiling(batch):
    """Return (tile_rows, padded_batch).

    >= 2 tiles whenever batch > 8 (v7x megacore), tiles <= 512 rows, tiles are
    multiples of 8, and the tile count minimizes (usually eliminates) padding.
    """
    if batch <= 8:
        return batch, batch                            # one full-extent tile
    n_tiles = max(2, _round_up(batch, 512) // 512)     # ceil(B/512), >= 2
    tile = _round_up(-(-batch // n_tiles), 8)
    return tile, n_tiles * tile


@jax.jit
def gen_lin_forward(x, kparams):
    """x: (B, in_dim) -> (B, in_dim) float32 log-probabilities."""
    batch, in_dim = x.shape
    hidden_p = kparams["w1"].shape[1]
    mid_p = kparams["w2"].shape[1]
    out_p = kparams["w3"].shape[1]
    out_dim = in_dim                                    # fc3 maps 100 -> in_dim

    tb, bp = _choose_batch_tiling(batch)
    grid = (bp // tb,)
    x_p = x if bp == batch else jnp.pad(x, ((0, bp - batch), (0, 0)))

    def resident(shape):
        # Constant block index for every grid step -> DMA'd once, stays in VMEM.
        return pl.BlockSpec(shape, lambda i: (0, 0))

    # Explicit VMEM budget: resident weights/biases (x2 for the pipeliner's
    # default double buffering), double-buffered x/out tiles, plus headroom for
    # the f32 intermediates of one batch tile.
    wbytes = sum(kparams[k].size * kparams[k].dtype.itemsize
                 for k in ("w1", "b1", "w2", "b2", "w3", "b3"))
    act_bytes = tb * (hidden_p + mid_p + 2 * out_p) * 4
    need = (2 * wbytes + 2 * tb * in_dim * x.dtype.itemsize
            + 2 * tb * out_p * 4 + act_bytes)
    vmem_limit = int(min(max(2 * need, 32 * 1024 * 1024), 64 * 1024 * 1024))

    out = pl.pallas_call(
        _gen_lin_kernel,
        out_shape=jax.ShapeDtypeStruct((bp, out_p), jnp.float32),
        grid=grid,
        in_specs=[
            pl.BlockSpec((tb, in_dim), lambda i: (i, 0)),   # x: tiled over batch
            resident((in_dim, hidden_p)),                    # w1
            resident((1, hidden_p)),                         # b1
            resident((hidden_p, mid_p)),                     # w2
            resident((1, mid_p)),                            # b2
            resident((mid_p, out_p)),                        # w3
            resident((1, out_p)),                            # b3
        ],
        out_specs=pl.BlockSpec((tb, out_p), lambda i: (i, 0)),
        compiler_params=pltpu.CompilerParams(
            dimension_semantics=("parallel",),
            vmem_limit_bytes=vmem_limit,
        ),
    )(x_p, kparams["w1"], kparams["b1"], kparams["w2"], kparams["b2"],
      kparams["w3"], kparams["b3"])

    out = out[:batch] if bp != batch else out
    return out[:, :out_dim] if out_p != out_dim else out


# ---------------------------------------------------------------------------
# Params (PyTorch nn.Linear default init) + kernel-layout packing
# ---------------------------------------------------------------------------
def init_params(key, in_dim, hidden, param_dtype=jnp.float32):
    """Returns (torch-layout f32 params for the reference,
                kernel-layout params: weights transposed to (in, out), every
                lane dim padded to a multiple of 128, biases as (1, N) rows
                with padded logit biases at -1e30, weights cast to param_dtype)."""
    ks = jax.random.split(key, 6)

    def u(k, shape, fan_in):
        bound = 1.0 / (fan_in ** 0.5)
        return jax.random.uniform(k, shape, jnp.float32, -bound, bound)

    out_dim = in_dim
    w1 = u(ks[0], (hidden, in_dim), in_dim)       # fc1.weight (out, in)
    b1 = u(ks[1], (hidden,), in_dim)
    w2 = u(ks[2], (MID_DIM, hidden), hidden)      # fc2.weight
    b2 = u(ks[3], (MID_DIM,), hidden)
    w3 = u(ks[4], (out_dim, MID_DIM), MID_DIM)    # fc3.weight
    b3 = u(ks[5], (out_dim,), MID_DIM)
    torch_p = dict(w1=w1, b1=b1, w2=w2, b2=b2, w3=w3, b3=b3)

    hidden_p = _round_up(hidden, 128)
    mid_p = _round_up(MID_DIM, 128)
    out_p = _round_up(out_dim, 128)

    def pad2(a, rows, cols, value=0.0):
        return jnp.pad(a, ((0, rows - a.shape[0]), (0, cols - a.shape[1])),
                       constant_values=value)

    kparams = dict(
        w1=pad2(w1.T, in_dim, hidden_p).astype(param_dtype),
        b1=pad2(b1[None, :], 1, hidden_p),
        w2=pad2(w2.T, hidden_p, mid_p).astype(param_dtype),
        b2=pad2(b2[None, :], 1, mid_p),
        w3=pad2(w3.T, mid_p, out_p).astype(param_dtype),
        b3=pad2(b3[None, :], 1, out_p, value=_NEG_PAD),
    )
    return torch_p, kparams


def reference_forward(x, p):
    """Plain-JAX replica of Gen_Lin.forward (torch layout, f32)."""
    h = jax.nn.relu(x @ p["w1"].T + p["b1"])
    h = jax.nn.relu(h @ p["w2"].T + p["b2"])
    z = h @ p["w3"].T + p["b3"]
    return jax.nn.log_softmax(z, axis=1)


if __name__ == "__main__":
    batch, in_dim, hidden = 2, 16, 32
    key = jax.random.PRNGKey(0)
    kx, kp = jax.random.split(key)
    x = jax.random.normal(kx, (batch, in_dim), jnp.float32)

    # f32 weights: padding is an exact numerical no-op -> tight tolerance.
    torch_p, kparams_f32 = init_params(kp, in_dim, hidden, jnp.float32)
    ref = reference_forward(x, torch_p)
    out_f32 = jax.block_until_ready(gen_lin_forward(x, kparams_f32))
    assert out_f32.shape == (batch, in_dim), out_f32.shape
    assert jnp.allclose(out_f32, ref, atol=1e-5, rtol=1e-5), (out_f32, ref)

    # bf16 weights (MXU-native on v6e/v7x, half the weight DMA / resident VMEM):
    # f32 accumulation, so only a slightly looser tolerance vs. the f32 reference.
    _, kparams_bf16 = init_params(kp, in_dim, hidden, jnp.bfloat16)
    out_bf16 = jax.block_until_ready(gen_lin_forward(x, kparams_bf16))
    assert out_bf16.shape == (batch, in_dim), out_bf16.shape
    assert jnp.allclose(out_bf16, ref, atol=5e-2, rtol=5e-2), (out_bf16, ref)

    print("KERNEL_OK")
</pallas_src>

<mosaic_0001>
module attributes {stable_mosaic.version = 11 : i64} {
  func.func @_gen_lin_kernel(%arg0: i32, %arg1: memref<2x16xf32, #tpu.memory_space<vmem>>, %arg2: memref<16x128xf32, #tpu.memory_space<vmem>>, %arg3: memref<1x128xf32, #tpu.memory_space<vmem>>, %arg4: memref<128x128xf32, #tpu.memory_space<vmem>>, %arg5: memref<1x128xf32, #tpu.memory_space<vmem>>, %arg6: memref<128x128xf32, #tpu.memory_space<vmem>>, %arg7: memref<1x128xf32, #tpu.memory_space<vmem>>, %arg8: memref<2x128xf32, #tpu.memory_space<vmem>>) attributes {dimension_semantics = [#tpu.dimension_semantics<parallel>], iteration_bounds = array<i64: 1>, scalar_prefetch = 0 : i64, scratch_operands = 0 : i64, tpu.core_type = #tpu.core_type<tc>, window_params = [{transform_indices = @transform_0, window_bounds = array<i64: 2, 16>}, {pipeline_mode = #tpu.pipeline_mode<synchronous>, transform_indices = @transform_1, window_bounds = array<i64: 16, 128>}, {pipeline_mode = #tpu.pipeline_mode<synchronous>, transform_indices = @transform_2, window_bounds = array<i64: 1, 128>}, {pipeline_mode = #tpu.pipeline_mode<synchronous>, transform_indices = @transform_3, window_bounds = array<i64: 128, 128>}, {pipeline_mode = #tpu.pipeline_mode<synchronous>, transform_indices = @transform_4, window_bounds = array<i64: 1, 128>}, {pipeline_mode = #tpu.pipeline_mode<synchronous>, transform_indices = @transform_5, window_bounds = array<i64: 128, 128>}, {pipeline_mode = #tpu.pipeline_mode<synchronous>, transform_indices = @transform_6, window_bounds = array<i64: 1, 128>}, {transform_indices = @transform_7, window_bounds = array<i64: 2, 128>}]} {
    %c0 = arith.constant 0 : index
    %c0_0 = arith.constant 0 : index
    %0 = vector.load %arg1[%c0, %c0_0] : memref<2x16xf32, #tpu.memory_space<vmem>>, vector<2x16xf32>
    %c0_1 = arith.constant 0 : index
    %c0_2 = arith.constant 0 : index
    %1 = vector.load %arg2[%c0_1, %c0_2] : memref<16x128xf32, #tpu.memory_space<vmem>>, vector<16x128xf32>
    %cst = arith.constant dense<0.000000e+00> : vector<2x128xf32>
    %2 = tpu.matmul %0, %1, %cst {dimension_numbers = #tpu.dot_dimension_numbers<[1], [0], [0], [1], [0, 0, 1, 1], [], []>} : vector<2x16xf32>, vector<16x128xf32>, vector<2x128xf32> -> vector<2x128xf32>
    %c0_3 = arith.constant 0 : index
    %c0_4 = arith.constant 0 : index
    %3 = vector.load %arg3[%c0_3, %c0_4] : memref<1x128xf32, #tpu.memory_space<vmem>>, vector<1x128xf32>
    %4 = vector.broadcast %3 : vector<1x128xf32> to vector<2x128xf32>
    %5 = arith.addf %2, %4 : vector<2x128xf32>
    %cst_5 = arith.constant 0.000000e+00 : f32
    %6 = vector.broadcast %cst_5 : f32 to vector<2x128xf32>
    %7 = arith.maximumf %5, %6 : vector<2x128xf32>
    %c0_6 = arith.constant 0 : index
    %c0_7 = arith.constant 0 : index
    %8 = vector.load %arg4[%c0_6, %c0_7] : memref<128x128xf32, #tpu.memory_space<vmem>>, vector<128x128xf32>
    %cst_8 = arith.constant dense<0.000000e+00> : vector<2x128xf32>
    %9 = tpu.matmul %7, %8, %cst_8 {dimension_numbers = #tpu.dot_dimension_numbers<[1], [0], [0], [1], [0, 0, 1, 1], [], []>} : vector<2x128xf32>, vector<128x128xf32>, vector<2x128xf32> -> vector<2x128xf32>
    %c0_9 = arith.constant 0 : index
    %c0_10 = arith.constant 0 : index
    %10 = vector.load %arg5[%c0_9, %c0_10] : memref<1x128xf32, #tpu.memory_space<vmem>>, vector<1x128xf32>
    %11 = vector.broadcast %10 : vector<1x128xf32> to vector<2x128xf32>
    %12 = arith.addf %9, %11 : vector<2x128xf32>
    %cst_11 = arith.constant 0.000000e+00 : f32
    %13 = vector.broadcast %cst_11 : f32 to vector<2x128xf32>
    %14 = arith.maximumf %12, %13 : vector<2x128xf32>
    %c0_12 = arith.constant 0 : index
    %c0_13 = arith.constant 0 : index
    %15 = vector.load %arg6[%c0_12, %c0_13] : memref<128x128xf32, #tpu.memory_space<vmem>>, vector<128x128xf32>
    %cst_14 = arith.constant dense<0.000000e+00> : vector<2x128xf32>
    %16 = tpu.matmul %14, %15, %cst_14 {dimension_numbers = #tpu.dot_dimension_numbers<[1], [0], [0], [1], [0, 0, 1, 1], [], []>} : vector<2x128xf32>, vector<128x128xf32>, vector<2x128xf32> -> vector<2x128xf32>
    %c0_15 = arith.constant 0 : index
    %c0_16 = arith.constant 0 : index
    %17 = vector.load %arg7[%c0_15, %c0_16] : memref<1x128xf32, #tpu.memory_space<vmem>>, vector<1x128xf32>
    %18 = vector.broadcast %17 : vector<1x128xf32> to vector<2x128xf32>
    %19 = arith.addf %16, %18 : vector<2x128xf32>
    %cst_17 = arith.constant dense<0xFF800000> : vector<2xf32>
    %20 = vector.multi_reduction <maximumf>, %19, %cst_17 [1] : vector<2x128xf32> to vector<2xf32>
    %21 = vector.shape_cast %20 : vector<2xf32> to vector<2x1xf32>
    %22 = vector.broadcast %21 : vector<2x1xf32> to vector<2x128xf32>
    %23 = arith.subf %19, %22 : vector<2x128xf32>
    %24 = math.exp %23 : vector<2x128xf32>
    %cst_18 = arith.constant dense<0.000000e+00> : vector<2xf32>
    %25 = vector.multi_reduction <add>, %24, %cst_18 [1] : vector<2x128xf32> to vector<2xf32>
    %26 = vector.shape_cast %25 : vector<2xf32> to vector<2x1xf32>
    %27 = math.log %26 : vector<2x1xf32>
    %28 = vector.broadcast %27 : vector<2x1xf32> to vector<2x128xf32>
    %29 = arith.subf %23, %28 : vector<2x128xf32>
    %c0_19 = arith.constant 0 : index
    %c0_20 = arith.constant 0 : index
    %30 = vector.load %arg8[%c0_19, %c0_20] : memref<2x128xf32, #tpu.memory_space<vmem>>, vector<2x128xf32>
    tpu.vector_store %arg8[%c0_19, %c0_20], %29 {strides = array<i32>} : memref<2x128xf32, #tpu.memory_space<vmem>>, vector<2x128xf32>,
    return
  }
  func.func @transform_0(%arg0: i32) -> (i32, i32) {
    %c0_i32 = arith.constant 0 : i32
    %c0_i32_0 = arith.constant 0 : i32
    return %arg0, %c0_i32 : i32, i32
  }
  func.func @transform_1(%arg0: i32) -> (i32, i32) {
    %c0_i32 = arith.constant 0 : i32
    %c0_i32_0 = arith.constant 0 : i32
    %c0_i32_1 = arith.constant 0 : i32
    return %c0_i32, %c0_i32_0 : i32, i32
  }
  func.func @transform_2(%arg0: i32) -> (i32, i32) {
    %c0_i32 = arith.constant 0 : i32
    %c0_i32_0 = arith.constant 0 : i32
    %c0_i32_1 = arith.constant 0 : i32
    return %c0_i32, %c0_i32_0 : i32, i32
  }
  func.func @transform_3(%arg0: i32) -> (i32, i32) {
    %c0_i32 = arith.constant 0 : i32
    %c0_i32_0 = arith.constant 0 : i32
    %c0_i32_1 = arith.constant 0 : i32
    return %c0_i32, %c0_i32_0 : i32, i32
  }
  func.func @transform_4(%arg0: i32) -> (i32, i32) {
    %c0_i32 = arith.constant 0 : i32
    %c0_i32_0 = arith.constant 0 : i32
    %c0_i32_1 = arith.constant 0 : i32
    return %c0_i32, %c0_i32_0 : i32, i32
  }
  func.func @transform_5(%arg0: i32) -> (i32, i32) {
    %c0_i32 = arith.constant 0 : i32
    %c0_i32_0 = arith.constant 0 : i32
    %c0_i32_1 = arith.constant 0 : i32
    return %c0_i32, %c0_i32_0 : i32, i32
  }
  func.func @transform_6(%arg0: i32) -> (i32, i32) {
    %c0_i32 = arith.constant 0 : i32
    %c0_i32_0 = arith.constant 0 : i32
    %c0_i32_1 = arith.constant 0 : i32
    return %c0_i32, %c0_i32_0 : i32, i32
  }
  func.func @transform_7(%arg0: i32) -> (i32, i32) {
    %c0_i32 = arith.constant 0 : i32
    %c0_i32_0 = arith.constant 0 : i32
    return %arg0, %c0_i32 : i32, i32
  }
}

</mosaic_0001>

<bundles_post_ra>
// kernel: gen_lin_forward.1
= control target key start
LH: loop header
LB: loop body
LE: loop exit
PB: predicated region body
PF: predicated region fallthrough
CT: control target
= control target key end

     0   :  { %12 = vsyncpa [#allocation3], 0  ;;  %s487_s0 = inlined_call_operand.hbm [shape: f32[2,16], index: 0, kind: input, shape index: {}]   ;;  %s488_s1 = inlined_call_operand.hbm [shape: f32[16,128], index: 1, kind: input, shape index: {}]   ;;  %s489_s2 = inlined_call_operand.hbm [shape: f32[1,128], index: 2, kind: input, shape index: {}]   ;;  %s490_s3 = inlined_call_operand.hbm [shape: f32[128,128], index: 3, kind: input, shape index: {}]   ;;  %s491_s4 = inlined_call_operand.vmem [shape: f32[1,128], index: 4, kind: input, shape index: {}]   ;;  %s492_s5 = inlined_call_operand.hbm [shape: f32[128,128], index: 5, kind: input, shape index: {}]   ;;  %s493_s6 = inlined_call_operand.vmem [shape: f32[1,128], index: 6, kind: input, shape index: {}]   ;;  %s494_s7 = inlined_call_operand.hbm [shape: f32[2,128], index: 7, kind: output, shape index: {}]  }
   0x1   :  { %13 = vsyncpa [#allocation6], 0 }
   0x2   :  { %14 = vsyncpa [#allocation9], 0  ;;  %s31_s26 = sshll.u32 %s488_s1, 4  ;;  %s32_s26 = int_to_ptr.hbm [resolvable:$true] %s31_s26 }
   0x3   :  { %15 = vsyncpa [#allocation4], 0  ;;  %s415_s27 = smov [#allocation5]   ;;  %s55_s8 = sshll.u32 %s490_s3, 4  ;;  %s56_s8 = int_to_ptr.hbm [resolvable:$true] %s55_s8 }
   0x4   :  { %s33_s28 = sshll.u32 %s415_s27, 4  ;;  %s416_s9 = smov 128   ;;  %s34_s28 = int_to_ptr.vmem [resolvable:$true] %s33_s28 }
   0x5   :  { %s417_s10 = smov 8   ;;  %s418_s11 = smov [#allocation8]  }
   0x6   :  { %39 = dma.hbm_to_vmem [thread:$0]  %s32_s26, 256, %s34_s28, [#allocation6], %s416_s9, %s416_s9, %s417_s10  }
   0x7   :  { %s57_s12 = sshll.u32 %s418_s11, 4  ;;  %s21_s15 = sshll.u32 %s487_s0, 4  ;;  %s58_s12 = int_to_ptr.vmem [resolvable:$true] %s57_s12  ;;  %s22_s15 = int_to_ptr.hbm [resolvable:$true] %s21_s15 }
   0x8   :  { %63 = dma.hbm_to_vmem [thread:$0]  %s56_s8, 2048, %s58_s12, [#allocation9], %s416_s9, %s416_s9, %s417_s10  }
   0x9   :  { %s45_s17 = sshll.u32 %s489_s2, 4  ;;  %s419_s18 = smov [#allocation2]   ;;  %s46_s17 = int_to_ptr.hbm [resolvable:$true] %s45_s17 }
   0xa   :  { %s23_s19 = sshll.u32 %s419_s18, 4  ;;  %s420_s3 = smov [#allocation7]   ;;  %s24_s19 = int_to_ptr.vmem [resolvable:$true] %s23_s19 }
   0xb   :  { %26 = dma.hbm_to_vmem [thread:$0]  %s22_s15, 32, %s24_s19, [#allocation3]  }
   0xc   :  { %s47_s20 = sshll.u32 %s420_s3, 4  ;;  %s70_s23 = sshll.u32 %s492_s5, 4  ;;  %s48_s20 = int_to_ptr.vmem [resolvable:$true] %s47_s20  ;;  %s71_s23 = int_to_ptr.hbm [resolvable:$true] %s70_s23 }
   0xd   :  { %50 = dma.hbm_to_vmem [thread:$0]  %s46_s17, 16, %s48_s20, [#allocation6]  }
   0xe   :  { %s421_s0 = smov [#allocation10]  }
   0xf   :  { %s72_s24 = sshll.u32 %s421_s0, 4  ;;  %s73_s24 = int_to_ptr.vmem [resolvable:$true] %s72_s24 }
  0x10   :  { %78 = dma.hbm_to_vmem [thread:$0]  %s71_s23, 2048, %s73_s24, [#allocation9], %s416_s9, %s416_s9, %s417_s10  }
  0x11   :  { %407 = dma.done.wait [#allocation3], 32  }
  0x12   :  { %408 = vsyncadd [#allocation3], 4294967264 }
  0x13   :  { %409 = dma.done.wait [#allocation6], 272  }
  0x14   :  { %410 = vsyncadd [#allocation6], 4294967024 }
  0x15   :  { %411 = dma.done.wait [#allocation9], 4096  }
  0x16   :  { %412 = vsyncadd [#allocation9], 4294963200  ;;  %v103_v0 = vld [vmem:[#allocation5 + $0x8] sm:$0xff]  ;;  %v102_v1 = vld [vmem:[#allocation5] sm:$0xff]  ;;  %vm108_vm0 = vcmask 130048   ;;  %vm214_vm1 = vcmask 1041408  }
  0x17   :  { %126 = vmatpush.msra.mxu0 %v103_v0  ;;  %v101_v2 = vld [vmem:[#allocation2] sm:$0x3]  ;;  %v148_v3 = vld [vmem:[#allocation8 + $0x78] sm:$0xff]  ;;  %v147_v4 = vld [vmem:[#allocation8 + $0x70] sm:$0xff] }
  0x18   :  { %153 = vmatpush.msra.mxu1 %v148_v3  ;;  %v146_v5 = vld [vmem:[#allocation8 + $0x68] sm:$0xff]  ;;  %v145_v6 = vld [vmem:[#allocation8 + $0x60] sm:$0xff]  ;;  %v144_v7 = vld [vmem:[#allocation8 + $0x58] sm:$0xff] }
  0x19   :  { %127 = vmatpush.msra.mxu0 %v102_v1  ;;  %v143_v8 = vld [vmem:[#allocation8 + $0x50] sm:$0xff]  ;;  %v142_v9 = vld [vmem:[#allocation8 + $0x48] sm:$0xff]  ;;  %v141_v10 = vld [vmem:[#allocation8 + $0x40] sm:$0xff] }
  0x1a   :  { %247 = vmatmul.msk.f32.vlgmr.msra.gmra.mxu0 %vm108_vm0, %v101_v2  ;;  %154 = vmatpush.msra.mxu1 %v147_v4  ;;  %v140_v11 = vld [vmem:[#allocation8 + $0x38] sm:$0xff]  ;;  %v139_v12 = vld [vmem:[#allocation8 + $0x30] sm:$0xff]  ;;  %v138_v13 = vld [vmem:[#allocation8 + $0x28] sm:$0xff] }
  0x1b   :  { %v137_v14 = vld [vmem:[#allocation8 + $0x20] sm:$0xff]  ;;  %v136_v15 = vld [vmem:[#allocation8 + $0x18] sm:$0xff]  ;;  %v135_v16 = vld [vmem:[#allocation8 + $0x10] sm:$0xff] }
  0x1c   :  { %155 = vmatpush.msra.mxu1 %v146_v5  ;;  %v134_v17 = vld [vmem:[#allocation8 + $0x8] sm:$0xff]  ;;  %v133_v18 = vld [vmem:[#allocation8] sm:$0xff]  ;;  %v189_v19 = vld [vmem:[#allocation10 + $0x78] sm:$0xff] }
  0x1d   :  { %v188_v20 = vld [vmem:[#allocation10 + $0x70] sm:$0xff]  ;;  %194 = vmatpush.msra.mxu2 %v189_v19  ;;  %v187_v21 = vld [vmem:[#allocation10 + $0x68] sm:$0xff]  ;;  %v186_v22 = vld [vmem:[#allocation10 + $0x60] sm:$0xff] }
  0x1e   :  { %156 = vmatpush.msra.mxu1 %v145_v6  ;;  %v185_v23 = vld [vmem:[#allocation10 + $0x58] sm:$0xff]  ;;  %v184_v24 = vld [vmem:[#allocation10 + $0x50] sm:$0xff]  ;;  %v183_v25 = vld [vmem:[#allocation10 + $0x48] sm:$0xff] }
  0x1f   :  { %195 = vmatpush.msra.mxu2 %v188_v20  ;;  %v182_v26 = vld [vmem:[#allocation10 + $0x40] sm:$0xff]  ;;  %v181_v27 = vld [vmem:[#allocation10 + $0x38] sm:$0xff]  ;;  %v180_v28 = vld [vmem:[#allocation10 + $0x30] sm:$0xff] }
  0x20   :  { %157 = vmatpush.msra.mxu1 %v144_v7  ;;  %v179_v29 = vld [vmem:[#allocation10 + $0x28] sm:$0xff]  ;;  %v178_v30 = vld [vmem:[#allocation10 + $0x20] sm:$0xff]  ;;  %v177_v31 = vld [vmem:[#allocation10 + $0x18] sm:$0xff] }
  0x21   :  { %196 = vmatpush.msra.mxu2 %v187_v21  ;;  %v256_v32 = vld [vmem:[#allocation7] ss:$0 sm:$0xff]  ;;  %v176_v36 = vld [vmem:[#allocation10 + $0x10] sm:$0xff]  ;;  %v175_v37 = vld [vmem:[#allocation10 + $0x8] sm:$0xff] }
  0x22   :  { %158 = vmatpush.msra.mxu1 %v143_v8  ;;  %v174_v38 = vld [vmem:[#allocation10] sm:$0xff]  ;;  %v257_v39 = vld [vmem:[%s491_s4] ss:$0 sm:$0xff]  ;;  %s422_s4 = smov [#allocation11]  }
  0x23   :  { %197 = vmatpush.msra.mxu2 %v186_v22  ;;  %v258_v43 = vld [vmem:[%s493_s6] ss:$0 sm:$0xff]  ;;  %s233_s27 = sshll.u32 %s422_s4, 4  ;;  %s235_s6 = sshll.u32 %s494_s7, 4  ;;  %s234_s27 = int_to_ptr.vmem [resolvable:$true] %s233_s27  ;;  %s236_s6 = int_to_ptr.hbm [resolvable:$true] %s235_s6 }
  0x24   :  { %159 = vmatpush.msra.mxu1 %v142_v9 }
  0x25   :  { %198 = vmatpush.msra.mxu2 %v185_v23 }
  0x26   :  { %160 = vmatpush.msra.mxu1 %v141_v10 }
  0x27   :  { %199 = vmatpush.msra.mxu2 %v184_v24 }
  0x28   :  { %161 = vmatpush.msra.mxu1 %v140_v11 }
  0x29   :  { %200 = vmatpush.msra.mxu2 %v183_v25 }
  0x2a   :  { %162 = vmatpush.msra.mxu1 %v139_v12 }
  0x2b   :  { %201 = vmatpush.msra.mxu2 %v182_v26 }
  0x2c   :  { %163 = vmatpush.msra.mxu1 %v138_v13 }
  0x2d   :  { %202 = vmatpush.msra.mxu2 %v181_v27 }
  0x2e   :  { %164 = vmatpush.msra.mxu1 %v137_v14 }
  0x2f   :  { %203 = vmatpush.msra.mxu2 %v180_v28 }
  0x30   :  { %165 = vmatpush.msra.mxu1 %v136_v15 }
  0x31   :  { %204 = vmatpush.msra.mxu2 %v179_v29 }
  0x32   :  { %166 = vmatpush.msra.mxu1 %v135_v16 }
  0x33   :  { %205 = vmatpush.msra.mxu2 %v178_v30 }
  0x34   :  { %167 = vmatpush.msra.mxu1 %v134_v17 }
  0x35   :  { %206 = vmatpush.msra.mxu2 %v177_v31 }
  0x36   :  { %168 = vmatpush.msra.mxu1 %v133_v18 }
  0x37   :  { %207 = vmatpush.msra.mxu2 %v176_v36 }
  0x39   :  { %208 = vmatpush.msra.mxu2 %v175_v37 }
  0x3b   :  { %209 = vmatpush.msra.mxu2 %v174_v38 }
  0x97   :  { %v129_v33 = vpop.f32.mrf.mxu0 }
  0x98   :  { %v130_v34 = vadd.f32 %v256_v32, %v129_v33 }
  0x9a   :  { %v132_v35 = vmax.f32 %v130_v34, 0.0 }
  0x9c   :  { %169 = vmatmul.f32.vlgmr.msra.gmra.mxu1 %v132_v35 }
 0x119   :  { %v170_v40 = vpop.f32.mrf.mxu1 }
 0x11a   :  { %v171_v41 = vadd.f32 %v257_v39, %v170_v40 }
 0x11c   :  { %v173_v42 = vmax.f32 %v171_v41, 0.0 }
 0x11e   :  { %210 = vmatmul.f32.vlgmr.msra.gmra.mxu2 %v173_v42 }
 0x1a1   :  { %v211_v44 = vpop.f32.mrf.mxu2 }
 0x1a2   :  { %v212_v45 = vadd.f32 %v258_v43, %v211_v44 }
 0x1a4   :  { %v215_v46 = vsel %vm214_vm1, %v212_v45, -inf }
 0x1a5   :  { %216 = vmax.xlane.f32.xlu0 %v215_v46 }
 0x218   :  { %v217_v47 = vpop.xlane.xlu0 %216 }
 0x219   :  { %v218_v48 = vsub.f32 %v212_v45, %v217_v47 }
 0x21b   :  { %v219_v49 = vmul.f32 1.442695, %v218_v48 }
 0x21d   :  { %259 = vpow2.f32 %v219_v49 }
 0x223   :  { %v260_v50 = vpop.eup %259 }
 0x224   :  { %v221_v51 = vsel %vm214_vm1, %v260_v50, 0.0 }
 0x225   :  { %222 = vadd.xlane.f32.xlu0 %v221_v51 }
 0x298   :  { %v223_v52 = vpop.xlane.xlu0 %222 }
 0x299   :  { %261 = vlog2.f32 %v223_v52 }
 0x29f   :  { %v262_v53 = vpop.eup %261 }
 0x2a0   :  { %v225_v54 = vmul.f32 0.6931472, %v262_v53 }
 0x2a2   :  { %v226_v55 = vsub.f32 %v218_v48, %v225_v54 }
 0x2a4   :  { %227 = vst [vmem:[#allocation11] sm:$0x3] %v226_v55 }
 0x2a5   :  { %238 = dma.vmem_to_hbm [thread:$0]  %s234_s27, 32, %s236_s6, [#allocation4]  }
 0x2a6   :  { %413 = dma.done.wait [#allocation4], 32  }
 0x2a7   :  { %414 = vsyncadd [#allocation4], 4294967264 }
 0x2a8   :  { %243 = vsyncpa [#allocation3], 1 }
 0x2a9   :  { %244 = vsyncpa [#allocation6], 1 }
 0x2aa   :  { %245 = vsyncpa [#allocation9], 1 }
 0x2ab   :  { %246 = vsyncpa [#allocation4], 1 }

</bundles_post_ra>
